<compile_context>
chip_gen: v7x
topology: tpu7x:2x2x1
jax: 0.10.0
libtpu: 0.0.40
codegen_flags: <defaults>
</compile_context>

<pallas_src>
import functools
import math

import jax
import jax.numpy as jnp
from jax import lax
from jax.experimental import pallas as pl
from jax.experimental.pallas import tpu as pltpu

LANE = 128


def _round_up(x, m):
    return ((x + m - 1) // m) * m


def _encoder_layer_kernel(x_ref,
                          wq_ref, wk_ref, wv_ref, wfc_ref,
                          w2_ref, w1_ref, vec_ref,
                          o_ref, *, dim_val, dim_attn):
    """One grid step processes a (TB, S, Dp) slab of the batch."""
    TB, S, Dp = x_ref.shape
    rows = TB * S

    x = x_ref[...].astype(jnp.float32)                 # residuals stay f32
    xf = x.reshape(rows, Dp)                           # fold (TB, S) -> M dim
    xb = xf.astype(jnp.bfloat16)                       # bf16 MXU operands

    # ---- single-head attention projections (one big GEMM each) ----
    q = jnp.dot(xb, wq_ref[...], preferred_element_type=jnp.float32)
    k = jnp.dot(xb, wk_ref[...], preferred_element_type=jnp.float32)
    v = jnp.dot(xb, wv_ref[...], preferred_element_type=jnp.float32)

    Ap = q.shape[-1]
    qb = q.reshape(TB, S, Ap).astype(jnp.bfloat16)
    kb = k.reshape(TB, S, Ap).astype(jnp.bfloat16)
    vb = v.reshape(TB, S, Dp).astype(jnp.bfloat16)

    # scores: transpose absorbed into the contraction (no explicit k.T)
    s = jnp.einsum('bqd,bkd->bqk', qb, kb, preferred_element_type=jnp.float32)
    s = s * (1.0 / math.sqrt(dim_attn))
    s = s - jnp.max(s, axis=-1, keepdims=True)         # stable softmax (f32)
    p = jnp.exp(s)
    p = p * pl.reciprocal(jnp.sum(p, axis=-1, keepdims=True), approx=True)

    att = jnp.einsum('bqk,bkd->bqd', p.astype(jnp.bfloat16), vb,
                     preferred_element_type=jnp.float32)            # (TB,S,Dp)
    a = jnp.dot(att.reshape(rows, Dp).astype(jnp.bfloat16), wfc_ref[...],
                preferred_element_type=jnp.float32)                 # (rows,Dp)

    inv_d = 1.0 / dim_val

    def layer_norm(h, gamma, beta):
        # Padded lanes of h are exactly 0, so summing over Dp equals summing
        # over the true dim_val; fused mean / mean-of-squares = 2 reductions.
        mu = jnp.sum(h, axis=-1, keepdims=True) * inv_d
        ms = jnp.sum(h * h, axis=-1, keepdims=True) * inv_d
        var = ms - mu * mu
        # gamma/beta are zero in padded lanes -> padded output lanes stay 0.
        return (h - mu) * lax.rsqrt(var + 1e-5) * gamma + beta

    b_fc2 = vec_ref[0:1, :]
    b_fc1 = vec_ref[1:2, :]
    g1, be1 = vec_ref[2:3, :], vec_ref[3:4, :]
    g2, be2 = vec_ref[4:5, :], vec_ref[5:6, :]

    # ---- LayerNorm1(x + a) ----
    x1 = layer_norm(xf + a, g1, be1)

    # ---- fc1( ELU( fc2(x1) ) ) ----
    z = jnp.dot(x1.astype(jnp.bfloat16), w2_ref[...],
                preferred_element_type=jnp.float32) + b_fc2
    # ELU(alpha=1): cancellation-free expm1 on the negative branch
    # (series for tiny |z|, exp(z)-1 otherwise), built from supported ops.
    zn = jnp.minimum(z, 0.0)
    em1 = jnp.where(zn > -1e-3, zn + 0.5 * zn * zn, jnp.exp(zn) - 1.0)
    e = jnp.where(z > 0, z, em1)
    a2 = jnp.dot(e.astype(jnp.bfloat16), w1_ref[...],
                 preferred_element_type=jnp.float32) + b_fc1

    # ---- LayerNorm2(x1 + a2) ----
    out = layer_norm(x1 + a2, g2, be2)

    o_ref[...] = out.reshape(TB, S, Dp).astype(o_ref.dtype)


def encoder_layer(x, params, *, block_batch=None):
    """x: (B, S, D) float32. params: dict of pre-transposed (in, out) weights."""
    B, S, D = x.shape
    A = params["wq"].shape[1]
    Dp = _round_up(D, LANE)
    Ap = _round_up(A, LANE)

    # Fold as many batch elements as possible into one grid step (M-dim growth),
    # capped so the flattened row count per GEMM stays modest.
    if block_batch is None:
        row_cap = 512
        block_batch = 1
        for tb in range(1, B + 1):
            if B % tb == 0 and tb * S <= row_cap:
                block_batch = tb
    TB = block_batch
    assert B % TB == 0, "block_batch must divide B"

    def pad2(w, r, c):
        return jnp.pad(w, ((0, r - w.shape[0]), (0, c - w.shape[1])))

    xp = jnp.pad(x, ((0, 0), (0, 0), (0, Dp - D)))

    # weights: zero-pad to lane-dense shapes and pre-cast to bf16 (MXU inputs)
    wq = pad2(params["wq"], Dp, Ap).astype(jnp.bfloat16)
    wk = pad2(params["wk"], Dp, Ap).astype(jnp.bfloat16)
    wv = pad2(params["wv"], Dp, Dp).astype(jnp.bfloat16)
    wfc = pad2(params["wfc"], Dp, Dp).astype(jnp.bfloat16)
    w2 = pad2(params["w_fc2"], Dp, Dp).astype(jnp.bfloat16)
    w1 = pad2(params["w_fc1"], Dp, Dp).astype(jnp.bfloat16)

    # pack the six (1, D) vectors into one (8, Dp) f32 slab (zero-padded):
    #   row 0: fc2 bias, row 1: fc1 bias, rows 2/3: LN1 gamma/beta,
    #   rows 4/5: LN2 gamma/beta, rows 6/7: padding.
    vec = jnp.zeros((8, Dp), jnp.float32)
    vec = vec.at[:6, :D].set(jnp.concatenate(
        [params["b_fc2"], params["b_fc1"], params["g1"], params["be1"],
         params["g2"], params["be2"]], axis=0))

    kernel = functools.partial(_encoder_layer_kernel, dim_val=D, dim_attn=A)

    def wspec(r, c):
        return pl.BlockSpec((r, c), lambda b: (0, 0))

    out = pl.pallas_call(
        kernel,
        out_shape=jax.ShapeDtypeStruct((B, S, Dp), x.dtype),
        grid=(B // TB,),
        in_specs=[
            pl.BlockSpec((TB, S, Dp), lambda b: (b, 0, 0)),   # x
            wspec(Dp, Ap),    # wq
            wspec(Dp, Ap),    # wk
            wspec(Dp, Dp),    # wv
            wspec(Dp, Dp),    # wfc (head-merge fc)
            wspec(Dp, Dp),    # fc2 weight
            wspec(Dp, Dp),    # fc1 weight
            wspec(8, Dp),     # packed biases / LayerNorm params
        ],
        out_specs=pl.BlockSpec((TB, S, Dp), lambda b: (b, 0, 0)),
        compiler_params=pltpu.CompilerParams(
            dimension_semantics=("parallel",),
            vmem_limit_bytes=64 * 1024 * 1024,
        ),
    )(xp, wq, wk, wv, wfc, w2, w1, vec)

    return out[:, :, :D]


def make_params(key, dim_val, dim_attn):
    ks = jax.random.split(key, 8)
    scale = 0.1
    return {
        # stored already transposed to (in, out)
        "wq":    scale * jax.random.normal(ks[0], (dim_val, dim_attn), jnp.float32),
        "wk":    scale * jax.random.normal(ks[1], (dim_val, dim_attn), jnp.float32),
        "wv":    scale * jax.random.normal(ks[2], (dim_val, dim_val), jnp.float32),
        "wfc":   scale * jax.random.normal(ks[3], (dim_val, dim_val), jnp.float32),
        "w_fc1": scale * jax.random.normal(ks[4], (dim_val, dim_val), jnp.float32),
        "b_fc1": scale * jax.random.normal(ks[5], (1, dim_val), jnp.float32),
        "w_fc2": scale * jax.random.normal(ks[6], (dim_val, dim_val), jnp.float32),
        "b_fc2": scale * jax.random.normal(ks[7], (1, dim_val), jnp.float32),
        "g1":  jnp.ones((1, dim_val), jnp.float32),
        "be1": jnp.zeros((1, dim_val), jnp.float32),
        "g2":  jnp.ones((1, dim_val), jnp.float32),
        "be2": jnp.zeros((1, dim_val), jnp.float32),
    }


def encoder_layer_ref(x, p):
    """Pure-JAX f32 reference of the PyTorch forward (n_heads=1)."""
    q = x @ p["wq"]; k = x @ p["wk"]; v = x @ p["wv"]
    s = (q @ jnp.swapaxes(k, -1, -2)) / jnp.sqrt(jnp.float32(q.shape[-1]))
    a = jax.nn.softmax(s, axis=-1) @ v
    a = a @ p["wfc"]

    def ln(h, g, b):
        mu = jnp.mean(h, -1, keepdims=True)
        var = jnp.mean((h - mu) ** 2, -1, keepdims=True)
        return (h - mu) / jnp.sqrt(var + 1e-5) * g + b

    x1 = ln(x + a, p["g1"], p["be1"])
    e = jax.nn.elu(x1 @ p["w_fc2"] + p["b_fc2"])
    a2 = e @ p["w_fc1"] + p["b_fc1"]
    return ln(x1 + a2, p["g2"], p["be2"])


if __name__ == "__main__":
    B, S, dim_val, dim_attn = 2, 8, 32, 32
    key = jax.random.PRNGKey(0)
    kx, kp = jax.random.split(key)
    x = jax.random.normal(kx, (B, S, dim_val), jnp.float32)
    params = make_params(kp, dim_val, dim_attn)

    out = jax.block_until_ready(encoder_layer(x, params))
    ref = encoder_layer_ref(x, params)

    assert out.shape == (B, S, dim_val)
    # tolerance accounts for bf16 MXU inputs (f32 accumulation) vs the f32 reference
    max_err = float(jnp.max(jnp.abs(out - ref)))
    assert jnp.allclose(out, ref, atol=3e-2, rtol=3e-2), f"mismatch vs reference (max abs err={max_err})"
    print("KERNEL_OK")
</pallas_src>

<mosaic_0001>
module attributes {stable_mosaic.version = 11 : i64} {
  func.func @_encoder_layer_kernel(%arg0: i32, %arg1: memref<2x8x128xf32, #tpu.memory_space<vmem>>, %arg2: memref<128x128xbf16, #tpu.memory_space<vmem>>, %arg3: memref<128x128xbf16, #tpu.memory_space<vmem>>, %arg4: memref<128x128xbf16, #tpu.memory_space<vmem>>, %arg5: memref<128x128xbf16, #tpu.memory_space<vmem>>, %arg6: memref<128x128xbf16, #tpu.memory_space<vmem>>, %arg7: memref<128x128xbf16, #tpu.memory_space<vmem>>, %arg8: memref<8x128xf32, #tpu.memory_space<vmem>>, %arg9: memref<2x8x128xf32, #tpu.memory_space<vmem>>) attributes {dimension_semantics = [#tpu.dimension_semantics<parallel>], iteration_bounds = array<i64: 1>, scalar_prefetch = 0 : i64, scratch_operands = 0 : i64, tpu.core_type = #tpu.core_type<tc>, window_params = [{transform_indices = @transform_0, window_bounds = array<i64: 2, 8, 128>}, {pipeline_mode = #tpu.pipeline_mode<synchronous>, transform_indices = @transform_1, window_bounds = array<i64: 128, 128>}, {pipeline_mode = #tpu.pipeline_mode<synchronous>, transform_indices = @transform_2, window_bounds = array<i64: 128, 128>}, {pipeline_mode = #tpu.pipeline_mode<synchronous>, transform_indices = @transform_3, window_bounds = array<i64: 128, 128>}, {pipeline_mode = #tpu.pipeline_mode<synchronous>, transform_indices = @transform_4, window_bounds = array<i64: 128, 128>}, {pipeline_mode = #tpu.pipeline_mode<synchronous>, transform_indices = @transform_5, window_bounds = array<i64: 128, 128>}, {pipeline_mode = #tpu.pipeline_mode<synchronous>, transform_indices = @transform_6, window_bounds = array<i64: 128, 128>}, {pipeline_mode = #tpu.pipeline_mode<synchronous>, transform_indices = @transform_7, window_bounds = array<i64: 8, 128>}, {transform_indices = @transform_8, window_bounds = array<i64: 2, 8, 128>}]} {
    %c0 = arith.constant 0 : index
    %c0_0 = arith.constant 0 : index
    %c0_1 = arith.constant 0 : index
    %0 = vector.load %arg1[%c0, %c0_0, %c0_1] : memref<2x8x128xf32, #tpu.memory_space<vmem>>, vector<2x8x128xf32>
    %1 = vector.shape_cast %0 : vector<2x8x128xf32> to vector<16x128xf32>
    %2 = arith.truncf %1 : vector<16x128xf32> to vector<16x128xbf16>
    %c0_2 = arith.constant 0 : index
    %c0_3 = arith.constant 0 : index
    %3 = vector.load %arg2[%c0_2, %c0_3] : memref<128x128xbf16, #tpu.memory_space<vmem>>, vector<128x128xbf16>
    %cst = arith.constant dense<0.000000e+00> : vector<16x128xf32>
    %4 = tpu.matmul %2, %3, %cst {dimension_numbers = #tpu.dot_dimension_numbers<[1], [0], [0], [1], [0, 0, 1, 1], [], []>} : vector<16x128xbf16>, vector<128x128xbf16>, vector<16x128xf32> -> vector<16x128xf32>
    %c0_4 = arith.constant 0 : index
    %c0_5 = arith.constant 0 : index
    %5 = vector.load %arg3[%c0_4, %c0_5] : memref<128x128xbf16, #tpu.memory_space<vmem>>, vector<128x128xbf16>
    %cst_6 = arith.constant dense<0.000000e+00> : vector<16x128xf32>
    %6 = tpu.matmul %2, %5, %cst_6 {dimension_numbers = #tpu.dot_dimension_numbers<[1], [0], [0], [1], [0, 0, 1, 1], [], []>} : vector<16x128xbf16>, vector<128x128xbf16>, vector<16x128xf32> -> vector<16x128xf32>
    %c0_7 = arith.constant 0 : index
    %c0_8 = arith.constant 0 : index
    %7 = vector.load %arg4[%c0_7, %c0_8] : memref<128x128xbf16, #tpu.memory_space<vmem>>, vector<128x128xbf16>
    %cst_9 = arith.constant dense<0.000000e+00> : vector<16x128xf32>
    %8 = tpu.matmul %2, %7, %cst_9 {dimension_numbers = #tpu.dot_dimension_numbers<[1], [0], [0], [1], [0, 0, 1, 1], [], []>} : vector<16x128xbf16>, vector<128x128xbf16>, vector<16x128xf32> -> vector<16x128xf32>
    %9 = vector.shape_cast %4 : vector<16x128xf32> to vector<2x8x128xf32>
    %10 = arith.truncf %9 : vector<2x8x128xf32> to vector<2x8x128xbf16>
    %11 = vector.shape_cast %6 : vector<16x128xf32> to vector<2x8x128xf32>
    %12 = arith.truncf %11 : vector<2x8x128xf32> to vector<2x8x128xbf16>
    %13 = vector.shape_cast %8 : vector<16x128xf32> to vector<2x8x128xf32>
    %14 = arith.truncf %13 : vector<2x8x128xf32> to vector<2x8x128xbf16>
    "tpu.trace_start"() <{level = 10 : i32, message = "bqd,bkd->bqk"}> : () -> ()
    %cst_10 = arith.constant dense<0.000000e+00> : vector<2x8x8xf32>
    %15 = tpu.matmul %10, %12, %cst_10 {dimension_numbers = #tpu.dot_dimension_numbers<[2], [2], [1], [1], [0, 0, 0, 1, 1, 1], [0], [0]>} : vector<2x8x128xbf16>, vector<2x8x128xbf16>, vector<2x8x8xf32> -> vector<2x8x8xf32>
    "tpu.trace_stop"() : () -> ()
    %cst_11 = arith.constant 0.176776692 : f32
    %16 = vector.broadcast %cst_11 : f32 to vector<2x8x8xf32>
    %17 = arith.mulf %15, %16 : vector<2x8x8xf32>
    %cst_12 = arith.constant dense<0xFF800000> : vector<2x8xf32>
    %18 = vector.multi_reduction <maximumf>, %17, %cst_12 [2] : vector<2x8x8xf32> to vector<2x8xf32>
    %19 = vector.shape_cast %18 : vector<2x8xf32> to vector<2x8x1xf32>
    %20 = vector.broadcast %19 : vector<2x8x1xf32> to vector<2x8x8xf32>
    %21 = arith.subf %17, %20 : vector<2x8x8xf32>
    %22 = math.exp %21 : vector<2x8x8xf32>
    %cst_13 = arith.constant dense<0.000000e+00> : vector<2x8xf32>
    %23 = vector.multi_reduction <add>, %22, %cst_13 [2] : vector<2x8x8xf32> to vector<2x8xf32>
    %24 = vector.shape_cast %23 : vector<2x8xf32> to vector<2x8x1xf32>
    %25 = tpu.reciprocal %24 {approx = true} : vector<2x8x1xf32> -> vector<2x8x1xf32>
    %26 = vector.broadcast %25 : vector<2x8x1xf32> to vector<2x8x8xf32>
    %27 = arith.mulf %22, %26 : vector<2x8x8xf32>
    %28 = arith.truncf %27 : vector<2x8x8xf32> to vector<2x8x8xbf16>
    "tpu.trace_start"() <{level = 10 : i32, message = "bqk,bkd->bqd"}> : () -> ()
    %cst_14 = arith.constant dense<0.000000e+00> : vector<2x8x128xf32>
    %29 = tpu.matmul %28, %14, %cst_14 {dimension_numbers = #tpu.dot_dimension_numbers<[2], [1], [1], [2], [0, 0, 0, 1, 1, 2], [0], [0]>} : vector<2x8x8xbf16>, vector<2x8x128xbf16>, vector<2x8x128xf32> -> vector<2x8x128xf32>
    "tpu.trace_stop"() : () -> ()
    %30 = vector.shape_cast %29 : vector<2x8x128xf32> to vector<16x128xf32>
    %31 = arith.truncf %30 : vector<16x128xf32> to vector<16x128xbf16>
    %c0_15 = arith.constant 0 : index
    %c0_16 = arith.constant 0 : index
    %32 = vector.load %arg5[%c0_15, %c0_16] : memref<128x128xbf16, #tpu.memory_space<vmem>>, vector<128x128xbf16>
    %cst_17 = arith.constant dense<0.000000e+00> : vector<16x128xf32>
    %33 = tpu.matmul %31, %32, %cst_17 {dimension_numbers = #tpu.dot_dimension_numbers<[1], [0], [0], [1], [0, 0, 1, 1], [], []>} : vector<16x128xbf16>, vector<128x128xbf16>, vector<16x128xf32> -> vector<16x128xf32>
    %c0_18 = arith.constant 0 : index
    %c0_19 = arith.constant 0 : index
    %34 = vector.load %arg8[%c0_18, %c0_19] : memref<8x128xf32, #tpu.memory_space<vmem>>, vector<1x128xf32>
    %c1 = arith.constant 1 : index
    %c0_20 = arith.constant 0 : index
    %35 = vector.load %arg8[%c1, %c0_20] : memref<8x128xf32, #tpu.memory_space<vmem>>, vector<1x128xf32>
    %c2 = arith.constant 2 : index
    %c0_21 = arith.constant 0 : index
    %36 = vector.load %arg8[%c2, %c0_21] : memref<8x128xf32, #tpu.memory_space<vmem>>, vector<1x128xf32>
    %c3 = arith.constant 3 : index
    %c0_22 = arith.constant 0 : index
    %37 = vector.load %arg8[%c3, %c0_22] : memref<8x128xf32, #tpu.memory_space<vmem>>, vector<1x128xf32>
    %c4 = arith.constant 4 : index
    %c0_23 = arith.constant 0 : index
    %38 = vector.load %arg8[%c4, %c0_23] : memref<8x128xf32, #tpu.memory_space<vmem>>, vector<1x128xf32>
    %c5 = arith.constant 5 : index
    %c0_24 = arith.constant 0 : index
    %39 = vector.load %arg8[%c5, %c0_24] : memref<8x128xf32, #tpu.memory_space<vmem>>, vector<1x128xf32>
    %40 = arith.addf %1, %33 : vector<16x128xf32>
    %cst_25 = arith.constant dense<0.000000e+00> : vector<16xf32>
    %41 = vector.multi_reduction <add>, %40, %cst_25 [1] : vector<16x128xf32> to vector<16xf32>
    %42 = vector.shape_cast %41 : vector<16xf32> to vector<16x1xf32>
    %cst_26 = arith.constant 3.125000e-02 : f32
    %43 = vector.broadcast %cst_26 : f32 to vector<16x1xf32>
    %44 = arith.mulf %42, %43 : vector<16x1xf32>
    %45 = arith.mulf %40, %40 : vector<16x128xf32>
    %cst_27 = arith.constant dense<0.000000e+00> : vector<16xf32>
    %46 = vector.multi_reduction <add>, %45, %cst_27 [1] : vector<16x128xf32> to vector<16xf32>
    %47 = vector.shape_cast %46 : vector<16xf32> to vector<16x1xf32>
    %cst_28 = arith.constant 3.125000e-02 : f32
    %48 = vector.broadcast %cst_28 : f32 to vector<16x1xf32>
    %49 = arith.mulf %47, %48 : vector<16x1xf32>
    %50 = arith.mulf %44, %44 : vector<16x1xf32>
    %51 = arith.subf %49, %50 : vector<16x1xf32>
    %52 = vector.broadcast %44 : vector<16x1xf32> to vector<16x128xf32>
    %53 = arith.subf %40, %52 : vector<16x128xf32>
    %cst_29 = arith.constant 9.99999974E-6 : f32
    %54 = vector.broadcast %cst_29 : f32 to vector<16x1xf32>
    %55 = arith.addf %51, %54 : vector<16x1xf32>
    %56 = math.rsqrt %55 : vector<16x1xf32>
    %57 = vector.broadcast %56 : vector<16x1xf32> to vector<16x128xf32>
    %58 = arith.mulf %53, %57 : vector<16x128xf32>
    %59 = vector.broadcast %36 : vector<1x128xf32> to vector<16x128xf32>
    %60 = arith.mulf %58, %59 : vector<16x128xf32>
    %61 = vector.broadcast %37 : vector<1x128xf32> to vector<16x128xf32>
    %62 = arith.addf %60, %61 : vector<16x128xf32>
    %63 = arith.truncf %62 : vector<16x128xf32> to vector<16x128xbf16>
    %c0_30 = arith.constant 0 : index
    %c0_31 = arith.constant 0 : index
    %64 = vector.load %arg6[%c0_30, %c0_31] : memref<128x128xbf16, #tpu.memory_space<vmem>>, vector<128x128xbf16>
    %cst_32 = arith.constant dense<0.000000e+00> : vector<16x128xf32>
    %65 = tpu.matmul %63, %64, %cst_32 {dimension_numbers = #tpu.dot_dimension_numbers<[1], [0], [0], [1], [0, 0, 1, 1], [], []>} : vector<16x128xbf16>, vector<128x128xbf16>, vector<16x128xf32> -> vector<16x128xf32>
    %66 = vector.broadcast %34 : vector<1x128xf32> to vector<16x128xf32>
    %67 = arith.addf %65, %66 : vector<16x128xf32>
    %cst_33 = arith.constant 0.000000e+00 : f32
    %68 = vector.broadcast %cst_33 : f32 to vector<16x128xf32>
    %69 = arith.minimumf %67, %68 : vector<16x128xf32>
    %cst_34 = arith.constant -1.000000e-03 : f32
    %70 = vector.broadcast %cst_34 : f32 to vector<16x128xf32>
    %71 = arith.cmpf ogt, %69, %70 : vector<16x128xf32>
    %cst_35 = arith.constant 5.000000e-01 : f32
    %72 = vector.broadcast %cst_35 : f32 to vector<16x128xf32>
    %73 = arith.mulf %72, %69 : vector<16x128xf32>
    %74 = arith.mulf %73, %69 : vector<16x128xf32>
    %75 = arith.addf %69, %74 : vector<16x128xf32>
    %76 = math.exp %69 : vector<16x128xf32>
    %cst_36 = arith.constant 1.000000e+00 : f32
    %77 = vector.broadcast %cst_36 : f32 to vector<16x128xf32>
    %78 = arith.subf %76, %77 : vector<16x128xf32>
    %79 = arith.select %71, %75, %78 : vector<16x128xi1>, vector<16x128xf32>
    %cst_37 = arith.constant 0.000000e+00 : f32
    %80 = vector.broadcast %cst_37 : f32 to vector<16x128xf32>
    %81 = arith.cmpf ogt, %67, %80 : vector<16x128xf32>
    %82 = arith.select %81, %67, %79 : vector<16x128xi1>, vector<16x128xf32>
    %83 = arith.truncf %82 : vector<16x128xf32> to vector<16x128xbf16>
    %c0_38 = arith.constant 0 : index
    %c0_39 = arith.constant 0 : index
    %84 = vector.load %arg7[%c0_38, %c0_39] : memref<128x128xbf16, #tpu.memory_space<vmem>>, vector<128x128xbf16>
    %cst_40 = arith.constant dense<0.000000e+00> : vector<16x128xf32>
    %85 = tpu.matmul %83, %84, %cst_40 {dimension_numbers = #tpu.dot_dimension_numbers<[1], [0], [0], [1], [0, 0, 1, 1], [], []>} : vector<16x128xbf16>, vector<128x128xbf16>, vector<16x128xf32> -> vector<16x128xf32>
    %86 = vector.broadcast %35 : vector<1x128xf32> to vector<16x128xf32>
    %87 = arith.addf %85, %86 : vector<16x128xf32>
    %88 = arith.addf %62, %87 : vector<16x128xf32>
    %cst_41 = arith.constant dense<0.000000e+00> : vector<16xf32>
    %89 = vector.multi_reduction <add>, %88, %cst_41 [1] : vector<16x128xf32> to vector<16xf32>
    %90 = vector.shape_cast %89 : vector<16xf32> to vector<16x1xf32>
    %cst_42 = arith.constant 3.125000e-02 : f32
    %91 = vector.broadcast %cst_42 : f32 to vector<16x1xf32>
    %92 = arith.mulf %90, %91 : vector<16x1xf32>
    %93 = arith.mulf %88, %88 : vector<16x128xf32>
    %cst_43 = arith.constant dense<0.000000e+00> : vector<16xf32>
    %94 = vector.multi_reduction <add>, %93, %cst_43 [1] : vector<16x128xf32> to vector<16xf32>
    %95 = vector.shape_cast %94 : vector<16xf32> to vector<16x1xf32>
    %cst_44 = arith.constant 3.125000e-02 : f32
    %96 = vector.broadcast %cst_44 : f32 to vector<16x1xf32>
    %97 = arith.mulf %95, %96 : vector<16x1xf32>
    %98 = arith.mulf %92, %92 : vector<16x1xf32>
    %99 = arith.subf %97, %98 : vector<16x1xf32>
    %100 = vector.broadcast %92 : vector<16x1xf32> to vector<16x128xf32>
    %101 = arith.subf %88, %100 : vector<16x128xf32>
    %cst_45 = arith.constant 9.99999974E-6 : f32
    %102 = vector.broadcast %cst_45 : f32 to vector<16x1xf32>
    %103 = arith.addf %99, %102 : vector<16x1xf32>
    %104 = math.rsqrt %103 : vector<16x1xf32>
    %105 = vector.broadcast %104 : vector<16x1xf32> to vector<16x128xf32>
    %106 = arith.mulf %101, %105 : vector<16x128xf32>
    %107 = vector.broadcast %38 : vector<1x128xf32> to vector<16x128xf32>
    %108 = arith.mulf %106, %107 : vector<16x128xf32>
    %109 = vector.broadcast %39 : vector<1x128xf32> to vector<16x128xf32>
    %110 = arith.addf %108, %109 : vector<16x128xf32>
    %111 = vector.shape_cast %110 : vector<16x128xf32> to vector<2x8x128xf32>
    %c0_46 = arith.constant 0 : index
    %c0_47 = arith.constant 0 : index
    %c0_48 = arith.constant 0 : index
    %112 = vector.load %arg9[%c0_46, %c0_47, %c0_48] : memref<2x8x128xf32, #tpu.memory_space<vmem>>, vector<2x8x128xf32>
    tpu.vector_store %arg9[%c0_46, %c0_47, %c0_48], %111 {strides = array<i32>} : memref<2x8x128xf32, #tpu.memory_space<vmem>>, vector<2x8x128xf32>,
    return
  }
  func.func @transform_0(%arg0: i32) -> (i32, i32, i32) {
    %c0_i32 = arith.constant 0 : i32
    %c0_i32_0 = arith.constant 0 : i32
    %c0_i32_1 = arith.constant 0 : i32
    return %arg0, %c0_i32, %c0_i32_0 : i32, i32, i32
  }
  func.func @transform_1(%arg0: i32) -> (i32, i32) {
    %c0_i32 = arith.constant 0 : i32
    %c0_i32_0 = arith.constant 0 : i32
    %c0_i32_1 = arith.constant 0 : i32
    return %c0_i32, %c0_i32_0 : i32, i32
  }
  func.func @transform_2(%arg0: i32) -> (i32, i32) {
    %c0_i32 = arith.constant 0 : i32
    %c0_i32_0 = arith.constant 0 : i32
    %c0_i32_1 = arith.constant 0 : i32
    return %c0_i32, %c0_i32_0 : i32, i32
  }
  func.func @transform_3(%arg0: i32) -> (i32, i32) {
    %c0_i32 = arith.constant 0 : i32
    %c0_i32_0 = arith.constant 0 : i32
    %c0_i32_1 = arith.constant 0 : i32
    return %c0_i32, %c0_i32_0 : i32, i32
  }
  func.func @transform_4(%arg0: i32) -> (i32, i32) {
    %c0_i32 = arith.constant 0 : i32
    %c0_i32_0 = arith.constant 0 : i32
    %c0_i32_1 = arith.constant 0 : i32
    return %c0_i32, %c0_i32_0 : i32, i32
  }
  func.func @transform_5(%arg0: i32) -> (i32, i32) {
    %c0_i32 = arith.constant 0 : i32
    %c0_i32_0 = arith.constant 0 : i32
    %c0_i32_1 = arith.constant 0 : i32
    return %c0_i32, %c0_i32_0 : i32, i32
  }
  func.func @transform_6(%arg0: i32) -> (i32, i32) {
    %c0_i32 = arith.constant 0 : i32
    %c0_i32_0 = arith.constant 0 : i32
    %c0_i32_1 = arith.constant 0 : i32
    return %c0_i32, %c0_i32_0 : i32, i32
  }
  func.func @transform_7(%arg0: i32) -> (i32, i32) {
    %c0_i32 = arith.constant 0 : i32
    %c0_i32_0 = arith.constant 0 : i32
    %c0_i32_1 = arith.constant 0 : i32
    return %c0_i32, %c0_i32_0 : i32, i32
  }
  func.func @transform_8(%arg0: i32) -> (i32, i32, i32) {
    %c0_i32 = arith.constant 0 : i32
    %c0_i32_0 = arith.constant 0 : i32
    %c0_i32_1 = arith.constant 0 : i32
    return %arg0, %c0_i32, %c0_i32_0 : i32, i32, i32
  }
}

</mosaic_0001>

<bundles_post_ra>
// kernel: tpu_custom_call.1
= control target key start
LH: loop header
LB: loop body
LE: loop exit
PB: predicated region body
PF: predicated region fallthrough
CT: control target
= control target key end

     0   :  { %13 = vsyncpa [#allocation3], 0  ;;  %s1961_s0 = inlined_call_operand.hbm [shape: f32[2,8,128], index: 0, kind: input, shape index: {}]   ;;  %s1962_s1 = inlined_call_operand.hbm [shape: bf16[128,128], index: 1, kind: input, shape index: {}]   ;;  %s1963_s2 = inlined_call_operand.hbm [shape: bf16[128,128], index: 2, kind: input, shape index: {}]   ;;  %s1964_s3 = inlined_call_operand.hbm [shape: bf16[128,128], index: 3, kind: input, shape index: {}]   ;;  %s1965_s4 = inlined_call_operand.hbm [shape: bf16[128,128], index: 4, kind: input, shape index: {}]   ;;  %s1966_s5 = inlined_call_operand.hbm [shape: bf16[128,128], index: 5, kind: input, shape index: {}]   ;;  %s1967_s6 = inlined_call_operand.hbm [shape: bf16[128,128], index: 6, kind: input, shape index: {}]   ;;  %s1968_s7 = inlined_call_operand.hbm [shape: f32[8,128], index: 7, kind: input, shape index: {}]   ;;  %s1969_s8 = inlined_call_operand.hbm [shape: f32[2,8,128], index: 8, kind: output, shape index: {}]  }
   0x1   :  { %14 = vsyncpa [#allocation6], 0 }
   0x2   :  { %15 = vsyncpa [#allocation9], 0 }
   0x3   :  { %16 = vsyncpa [#allocation12], 0 }
   0x4   :  { %17 = vsyncpa [#allocation15], 0 }
   0x5   :  { %18 = vsyncpa [#allocation4], 0  ;;  %s1676_s27 = smov [#allocation5]   ;;  %s1466_s9 = scalar_lea.hbm %s1962_s1, 1024 }
   0x6   :  { %s36_s28 = sshll.u32 %s1676_s27, 4  ;;  %p1467_p0 = scmp.ne.s32.totalorder %s1962_s1, %s1466_s9  ;;  %s37_s28 = int_to_ptr.vmem [resolvable:$true] %s36_s28 }
   0x7   :  { %p1470_p1 = scmp.lt.u32.totalorder %s1466_s9, %s1962_s1 }
   0x9   :  { %p1472_p2 = pnand %p1470_p1, %p1467_p0 }
   0xb   :  { %1475 = shalt.err (!%p1472_p2)
}
   0xc   :  { %s1476_s14 = scalar_lea.vmem %s37_s28, 1024  ;;  %p1481_p4 = scmp.lt.s32.totalorder %s37_s28, %s37_s28 }
   0xd   :  { %p1477_p3 = scmp.ne.s32.totalorder %s37_s28, %s1476_s14  ;;  %p1482_p5 = scmp.lt.s32.totalorder %s1476_s14, %s1476_s14 }
   0xf   :  { %p1483_p6 = por %p1482_p5, %p1481_p4 }
  0x11   :  { %p1484_p7 = pnand %p1483_p6, %p1477_p3 }
  0x13   :  { %1487 = shalt.err (!%p1484_p7)
}
  0x14   :  { %s1677_s15 = smov 64   ;;  %s1678_s16 = smov 4  }
  0x15   :  { %42 = dma.hbm_to_vmem [thread:$0]  %s1962_s1, 1024, %s37_s28, [#allocation6], %s1677_s15, %s1677_s15, %s1678_s16  }
  0x16   :  { %s1679_s19 = smov [#allocation8]   ;;  %s1680_s21 = smov [#allocation11]  }
  0x17   :  { %s60_s20 = sshll.u32 %s1679_s19, 4  ;;  %s84_s22 = sshll.u32 %s1680_s21, 4  ;;  %s61_s20 = int_to_ptr.vmem [resolvable:$true] %s60_s20  ;;  %s85_s22 = int_to_ptr.vmem [resolvable:$true] %s84_s22 }
  0x18   :  { %s1488_s25 = scalar_lea.hbm %s1964_s3, 1024 }
  0x19   :  { %p1489_p8 = scmp.ne.s32.totalorder %s1964_s3, %s1488_s25  ;;  %p1492_p9 = scmp.lt.u32.totalorder %s1488_s25, %s1964_s3 }
  0x1b   :  { %p1494_p10 = pnand %p1492_p9, %p1489_p8 }
  0x1d   :  { %1497 = shalt.err (!%p1494_p10)
}
  0x1e   :  { %s1498_s1 = scalar_lea.vmem %s61_s20, 1024  ;;  %p1503_p12 = scmp.lt.s32.totalorder %s61_s20, %s61_s20 }
  0x1f   :  { %p1499_p11 = scmp.ne.s32.totalorder %s61_s20, %s1498_s1  ;;  %p1504_p13 = scmp.lt.s32.totalorder %s1498_s1, %s1498_s1 }
  0x21   :  { %p1505_p0 = por %p1504_p13, %p1503_p12 }
  0x23   :  { %p1506_p1 = pnand %p1505_p0, %p1499_p11 }
  0x25   :  { %1509 = shalt.err (!%p1506_p1)
}
  0x26   :  { %66 = dma.hbm_to_vmem [thread:$0]  %s1964_s3, 1024, %s61_s20, [#allocation9], %s1677_s15, %s1677_s15, %s1678_s16  }
  0x27   :  { %s1510_s12 = scalar_lea.hbm %s1966_s5, 1024 }
  0x28   :  { %p1511_p2 = scmp.ne.s32.totalorder %s1966_s5, %s1510_s12  ;;  %p1514_p3 = scmp.lt.u32.totalorder %s1510_s12, %s1966_s5 }
  0x2a   :  { %p1516_p4 = pnand %p1514_p3, %p1511_p2 }
  0x2c   :  { %1519 = shalt.err (!%p1516_p4)
}
  0x2d   :  { %s1520_s19 = scalar_lea.vmem %s85_s22, 1024  ;;  %p1525_p6 = scmp.lt.s32.totalorder %s85_s22, %s85_s22 }
  0x2e   :  { %p1521_p5 = scmp.ne.s32.totalorder %s85_s22, %s1520_s19  ;;  %p1526_p7 = scmp.lt.s32.totalorder %s1520_s19, %s1520_s19 }
  0x30   :  { %p1527_p8 = por %p1526_p7, %p1525_p6 }
  0x32   :  { %p1528_p9 = pnand %p1527_p8, %p1521_p5 }
  0x34   :  { %1531 = shalt.err (!%p1528_p9)
}
  0x35   :  { %90 = dma.hbm_to_vmem [thread:$0]  %s1966_s5, 1024, %s85_s22, [#allocation12], %s1677_s15, %s1677_s15, %s1678_s16  }
  0x36   :  { %s1681_s21 = smov [#allocation2]   ;;  %s1532_s26 = scalar_lea.hbm %s1961_s0, 256 }
  0x37   :  { %s24_s23 = sshll.u32 %s1681_s21, 4  ;;  %p1533_p10 = scmp.ne.s32.totalorder %s1961_s0, %s1532_s26  ;;  %s25_s23 = int_to_ptr.vmem [resolvable:$true] %s24_s23 }
  0x38   :  { %p1536_p11 = scmp.lt.u32.totalorder %s1532_s26, %s1961_s0 }
  0x3a   :  { %p1538_p12 = pnand %p1536_p11, %p1533_p10 }
  0x3c   :  { %1541 = shalt.err (!%p1538_p12)
}
  0x3d   :  { %s1542_s28 = scalar_lea.vmem %s25_s23, 256  ;;  %p1547_p0 = scmp.lt.s32.totalorder %s25_s23, %s25_s23 }
  0x3e   :  { %p1543_p13 = scmp.ne.s32.totalorder %s25_s23, %s1542_s28  ;;  %p1548_p1 = scmp.lt.s32.totalorder %s1542_s28, %s1542_s28 }
  0x40   :  { %p1549_p2 = por %p1548_p1, %p1547_p0 }
  0x42   :  { %p1550_p3 = pnand %p1549_p2, %p1543_p13 }
  0x44   :  { %1553 = shalt.err (!%p1550_p3)
}
  0x45   :  { %s1682_s5 = smov 128   ;;  %s1683_s22 = smov 8  }
  0x46   :  { %30 = dma.hbm_to_vmem [thread:$0]  %s1961_s0, 256, %s25_s23, [#allocation3], %s1682_s5, %s1682_s5, %s1683_s22  }
  0x47   :  { %s1684_s11 = smov [#allocation7]   ;;  %s1685_s13 = smov [#allocation10]  }
  0x48   :  { %s48_s12 = sshll.u32 %s1684_s11, 4  ;;  %s72_s14 = sshll.u32 %s1685_s13, 4  ;;  %s49_s12 = int_to_ptr.vmem [resolvable:$true] %s48_s12  ;;  %s1796_s14 = int_to_ptr.vmem [resolvable:$true] %s72_s14 }
  0x49   :  { %s1554_s19 = scalar_lea.hbm %s1963_s2, 1024 }
  0x4a   :  { %p1555_p4 = scmp.ne.s32.totalorder %s1963_s2, %s1554_s19  ;;  %p1558_p5 = scmp.lt.u32.totalorder %s1554_s19, %s1963_s2 }
  0x4c   :  { %p1560_p6 = pnand %p1558_p5, %p1555_p4 }
  0x4e   :  { %1563 = shalt.err (!%p1560_p6)
}
  0x4f   :  { %s1564_s0 = scalar_lea.vmem %s49_s12, 1024  ;;  %p1569_p8 = scmp.lt.s32.totalorder %s49_s12, %s49_s12 }
  0x50   :  { %p1565_p7 = scmp.ne.s32.totalorder %s49_s12, %s1564_s0  ;;  %p1570_p9 = scmp.lt.s32.totalorder %s1564_s0, %s1564_s0 }
  0x52   :  { %p1571_p10 = por %p1570_p9, %p1569_p8 }
  0x54   :  { %p1572_p11 = pnand %p1571_p10, %p1565_p7 }
  0x56   :  { %1575 = shalt.err (!%p1572_p11)
}
  0x57   :  { %54 = dma.hbm_to_vmem [thread:$0]  %s1963_s2, 1024, %s49_s12, [#allocation6], %s1677_s15, %s1677_s15, %s1678_s16  }
  0x58   :  { %s1576_s29 = scalar_lea.hbm %s1965_s4, 1024 }
  0x59   :  { %p1577_p12 = scmp.ne.s32.totalorder %s1965_s4, %s1576_s29  ;;  %p1580_p13 = scmp.lt.u32.totalorder %s1576_s29, %s1965_s4 }
  0x5b   :  { %p1582_p0 = pnand %p1580_p13, %p1577_p12 }
  0x5d   :  { %1585 = shalt.err (!%p1582_p0)
}
  0x5e   :  { %s1586_s10 = scalar_lea.vmem %s1796_s14, 1024  ;;  %p1591_p2 = scmp.lt.s32.totalorder %s1796_s14, %s1796_s14 }
  0x5f   :  { %p1587_p1 = scmp.ne.s32.totalorder %s1796_s14, %s1586_s10  ;;  %p1592_p3 = scmp.lt.s32.totalorder %s1586_s10, %s1586_s10 }
  0x61   :  { %p1593_p4 = por %p1592_p3, %p1591_p2 }
  0x63   :  { %p1594_p5 = pnand %p1593_p4, %p1587_p1 }
  0x65   :  { %1597 = shalt.err (!%p1594_p5)
}
  0x66   :  { %78 = dma.hbm_to_vmem [thread:$0]  %s1965_s4, 1024, %s1796_s14, [#allocation9], %s1677_s15, %s1677_s15, %s1678_s16  }
  0x67   :  { %s1686_s12 = smov [#allocation13]   ;;  %s1687_s17 = smov [#allocation14]  }
  0x68   :  { %s96_s13 = sshll.u32 %s1686_s12, 4  ;;  %s109_s18 = sshll.u32 %s1687_s17, 4  ;;  %s97_s13 = int_to_ptr.vmem [resolvable:$true] %s96_s13  ;;  %s110_s18 = int_to_ptr.vmem [resolvable:$true] %s109_s18 }
  0x69   :  { %s1598_s20 = scalar_lea.hbm %s1967_s6, 1024 }
  0x6a   :  { %p1599_p6 = scmp.ne.s32.totalorder %s1967_s6, %s1598_s20  ;;  %p1602_p7 = scmp.lt.u32.totalorder %s1598_s20, %s1967_s6 }
  0x6c   :  { %p1604_p8 = pnand %p1602_p7, %p1599_p6 }
  0x6e   :  { %1607 = shalt.err (!%p1604_p8)
}
  0x6f   :  { %s1608_s4 = scalar_lea.vmem %s97_s13, 1024  ;;  %p1613_p10 = scmp.lt.s32.totalorder %s97_s13, %s97_s13 }
  0x70   :  { %p1609_p9 = scmp.ne.s32.totalorder %s97_s13, %s1608_s4  ;;  %p1614_p11 = scmp.lt.s32.totalorder %s1608_s4, %s1608_s4 }
  0x72   :  { %p1615_p12 = por %p1614_p11, %p1613_p10 }
  0x74   :  { %p1616_p13 = pnand %p1615_p12, %p1609_p9 }
  0x76   :  { %1619 = shalt.err (!%p1616_p13)
}
  0x77   :  { %102 = dma.hbm_to_vmem [thread:$0]  %s1967_s6, 1024, %s97_s13, [#allocation12], %s1677_s15, %s1677_s15, %s1678_s16  }
  0x78   :  { %s1620_s29 = scalar_lea.hbm %s1968_s7, 128 }
  0x79   :  { %p1621_p0 = scmp.ne.s32.totalorder %s1968_s7, %s1620_s29  ;;  %p1624_p1 = scmp.lt.u32.totalorder %s1620_s29, %s1968_s7 }
  0x7b   :  { %p1626_p2 = pnand %p1624_p1, %p1621_p0 }
  0x7d   :  { %1629 = shalt.err (!%p1626_p2)
}
  0x7e   :  { %s1630_s10 = scalar_lea.vmem %s110_s18, 128  ;;  %p1635_p4 = scmp.lt.s32.totalorder %s110_s18, %s110_s18 }
  0x7f   :  { %p1631_p3 = scmp.ne.s32.totalorder %s110_s18, %s1630_s10  ;;  %p1636_p5 = scmp.lt.s32.totalorder %s1630_s10, %s1630_s10 }
  0x81   :  { %p1637_p6 = por %p1636_p5, %p1635_p4 }
  0x83   :  { %p1638_p7 = pnand %p1637_p6, %p1631_p3 }
  0x85   :  { %1641 = shalt.err (!%p1638_p7)
}
  0x86   :  { %112 = dma.hbm_to_vmem [thread:$0]  %s1968_s7, 128, %s110_s18, [#allocation15]  }
  0x87   :  { %1664 = dma.done.wait [#allocation3], 256  }
  0x88   :  { %1665 = vsyncadd [#allocation3], 4294967040 }
  0x89   :  { %1666 = dma.done.wait [#allocation6], 2048  }
  0x8a   :  { %1667 = vsyncadd [#allocation6], 4294965248 }
  0x8b   :  { %1668 = dma.done.wait [#allocation9], 2048  }
  0x8c   :  { %1669 = vsyncadd [#allocation9], 4294965248 }
  0x8d   :  { %1670 = dma.done.wait [#allocation12], 2048  }
  0x8e   :  { %1671 = vsyncadd [#allocation12], 4294965248 }
  0x8f   :  { %1672 = dma.done.wait [#allocation15], 128  }
  0x90   :  { %1673 = vsyncadd [#allocation15], 4294967168  ;;  %v1688_v0 = vmov 0.0   ;;  %vm1689_vm0 = vmmov 0   ;;  %v1398_v1 = vld [vmem:[#allocation7] sm:$0xff]   ;;  %v1399_v2 = vld [vmem:[#allocation7 + $0x8] sm:$0xff]  }
  0x91   :  { %1259 = vmatprep.subr.bf16.mxu1 %v1688_v0  ;;  %1239 = vmatprep.subr.bf16.mxu0 %v1688_v0  ;;  %v1400_v3 = vld [vmem:[#allocation5] sm:$0xff]   ;;  %v1402_v4 = vld [vmem:[#allocation5 + $0x8] sm:$0xff]   ;;  %v1401_v5 = vld [vmem:[#allocation7 + $0x10] sm:$0xff]   ;;  %vm544_vm1 = vcmask 64512   ;;  %vm572_vm2 = vcmask 1043456   ;;  %s1690_s7 = smov [#allocation16]  }
  0x92   :  { %1275 = vmatprep.mubr.msk.bf16.mxu1 %vm1689_vm0, %v1688_v0  ;;  %1255 = vmatprep.mubr.msk.bf16.mxu0 %vm1689_vm0, %v1688_v0  ;;  %v1404_v6 = vld [vmem:[#allocation5 + $0x10] sm:$0xff]   ;;  %v1403_v7 = vld [vmem:[#allocation7 + $0x18] sm:$0xff]   ;;  %v1405_v9 = vld [vmem:[#allocation7 + $0x20] sm:$0xff]   ;;  %s1103_s16 = sshll.u32 %s1690_s7, 4  ;;  %s1104_s16 = int_to_ptr.vmem [resolvable:$true] %s1103_s16 }
  0x93   :  { %1260 = vmatpush3.bf16.msra.mxu1 %v1398_v1  ;;  %1240 = vmatpush3.bf16.msra.mxu0 %v1400_v3  ;;  %v1406_v8 = vld [vmem:[#allocation5 + $0x18] sm:$0xff]   ;;  %v1407_v10 = vld [vmem:[#allocation7 + $0x28] sm:$0xff]   ;;  %v1408_v11 = vld [vmem:[#allocation5 + $0x20] sm:$0xff]   ;;  %s1642_s2 = scalar_lea.vmem %s1104_s16, 256  ;;  %p1647_p9 = scmp.lt.s32.totalorder %s1104_s16, %s1104_s16 }
  0x94   :  { %1261 = vmatprep.subr.bf16.mxu1 %v1688_v0  ;;  %1241 = vmatprep.subr.bf16.mxu0 %v1688_v0  ;;  %v1410_v12 = vld [vmem:[#allocation5 + $0x28] sm:$0xff]   ;;  %v1409_v13 = vld [vmem:[#allocation7 + $0x30] sm:$0xff]   ;;  %v1411_v15 = vld [vmem:[#allocation7 + $0x38] sm:$0xff]   ;;  %p1643_p8 = scmp.ne.s32.totalorder %s1104_s16, %s1642_s2  ;;  %p1648_p10 = scmp.lt.s32.totalorder %s1642_s2, %s1642_s2 }
  0x95   :  { %v1412_v14 = vld [vmem:[#allocation5 + $0x30] sm:$0xff]   ;;  %v1879_v17 = vld [vmem:[#allocation2 + $0x8] sm:$0xff]  ;;  %v1414_v32 = vld [vmem:[#allocation8] sm:$0xff]  }
  0x96   :  { %v1877_v16 = vld [vmem:[#allocation2] sm:$0xff]  ;;  %v1413_v18 = vld [vmem:[#allocation5 + $0x38] sm:$0xff]   ;;  %v1415_v33 = vld [vmem:[#allocation8 + $0x8] sm:$0xff]   ;;  %p1649_p11 = por %p1648_p10, %p1647_p9 }
  0x97   :  { %1262 = vmatpush3.bf16.msra.mxu1 %v1399_v2  ;;  %1242 = vmatpush3.bf16.msra.mxu0 %v1402_v4  ;;  %v140_v19 = vpack.c.bf16 %v1879_v17, %v1877_v16  ;;  %v1416_v34 = vld [vmem:[#allocation8 + $0x10] sm:$0xff]   ;;  %v1417_v35 = vld [vmem:[#allocation8 + $0x18] sm:$0xff]   ;;  %v1418_v36 = vld [vmem:[#allocation8 + $0x20] sm:$0xff]  }
  0x98   :  { %1263 = vmatprep.subr.bf16.mxu1 %v1688_v0  ;;  %1243 = vmatprep.subr.bf16.mxu0 %v1688_v0  ;;  %v1419_v37 = vld [vmem:[#allocation8 + $0x28] sm:$0xff]   ;;  %v1420_v38 = vld [vmem:[#allocation8 + $0x30] sm:$0xff]   ;;  %v1421_v39 = vld [vmem:[#allocation8 + $0x38] sm:$0xff]   ;;  %p1650_p12 = pnand %p1649_p11, %p1643_p8 }
  0x9b   :  { %1264 = vmatpush3.bf16.msra.mxu1 %v1401_v5  ;;  %1244 = vmatpush3.bf16.msra.mxu0 %v1404_v6 }
  0x9c   :  { %1265 = vmatprep.subr.bf16.mxu1 %v1688_v0  ;;  %1245 = vmatprep.subr.bf16.mxu0 %v1688_v0 }
  0x9f   :  { %1266 = vmatpush3.bf16.msra.mxu1 %v1403_v7  ;;  %1246 = vmatpush3.bf16.msra.mxu0 %v1406_v8  ;;  %v1422_v7 = vld [vmem:[#allocation10] sm:$0xff]   ;;  %v1423_v8 = vld [vmem:[#allocation10 + $0x8] sm:$0xff]  }
  0xa0   :  { %1267 = vmatprep.subr.bf16.mxu1 %v1688_v0  ;;  %1247 = vmatprep.subr.bf16.mxu0 %v1688_v0 }
  0xa3   :  { %1268 = vmatpush3.bf16.msra.mxu1 %v1405_v9  ;;  %1248 = vmatpush3.bf16.msra.mxu0 %v1408_v11  ;;  %v1424_v9 = vld [vmem:[#allocation10 + $0x10] sm:$0xff]   ;;  %v1426_v11 = vld [vmem:[#allocation10 + $0x20] sm:$0xff]  }
  0xa4   :  { %1269 = vmatprep.subr.bf16.mxu1 %v1688_v0  ;;  %1249 = vmatprep.subr.bf16.mxu0 %v1688_v0 }
  0xa7   :  { %1270 = vmatpush3.bf16.msra.mxu1 %v1407_v10  ;;  %1250 = vmatpush3.bf16.msra.mxu0 %v1410_v12  ;;  %v1425_v10 = vld [vmem:[#allocation10 + $0x18] sm:$0xff]  }
  0xa8   :  { %1271 = vmatprep.subr.bf16.mxu1 %v1688_v0  ;;  %1251 = vmatprep.subr.bf16.mxu0 %v1688_v0 }
  0xab   :  { %1272 = vmatpush3.bf16.msra.mxu1 %v1409_v13  ;;  %1252 = vmatpush3.bf16.msra.mxu0 %v1412_v14 }
  0xac   :  { %1273 = vmatprep.subr.bf16.mxu1 %v1688_v0  ;;  %1253 = vmatprep.subr.bf16.mxu0 %v1688_v0 }
  0xaf   :  { %1274 = vmatpush3.bf16.msra.mxu1 %v1411_v15  ;;  %1254 = vmatpush3.bf16.msra.mxu0 %v1413_v18 }
  0xb0   :  { %1299 = vmatprep.subr.bf16.mxu1 %v1688_v0  ;;  %1279 = vmatprep.subr.bf16.mxu0 %v1688_v0 }
  0xb2   :  { %1276 = vmatmul.mubr.bf16.vlgmr.msra.gmra.mrb[0].mxu1 %v140_v19  ;;  %1256 = vmatmul.mubr.bf16.vlgmr.msra.gmra.mrb[0].mxu0 %v140_v19 }
  0xb3   :  { %1301 = vmatprep.mubr.msk.bf16.mxu1 %vm1689_vm0, %v1688_v0  ;;  %1295 = vmatprep.mubr.msk.bf16.mxu0 %vm1689_vm0, %v1688_v0 }
  0xb4   :  { %1280 = vmatpush3.bf16.msra.mxu0 %v1414_v32 }
  0xb5   :  { %1281 = vmatprep.subr.bf16.mxu0 %v1688_v0 }
  0xb8   :  { %1282 = vmatpush3.bf16.msra.mxu0 %v1415_v33 }
  0xb9   :  { %1283 = vmatprep.subr.bf16.mxu0 %v1688_v0 }
  0xbc   :  { %1284 = vmatpush3.bf16.msra.mxu0 %v1416_v34 }
  0xbd   :  { %1285 = vmatprep.subr.bf16.mxu0 %v1688_v0 }
  0xc0   :  { %1286 = vmatpush3.bf16.msra.mxu0 %v1417_v35 }
  0xc1   :  { %1287 = vmatprep.subr.bf16.mxu0 %v1688_v0 }
  0xc4   :  { %1288 = vmatpush3.bf16.msra.mxu0 %v1418_v36 }
  0xc5   :  { %1289 = vmatprep.subr.bf16.mxu0 %v1688_v0 }
  0xc8   :  { %1290 = vmatpush3.bf16.msra.mxu0 %v1419_v37 }
  0xc9   :  { %1291 = vmatprep.subr.bf16.mxu0 %v1688_v0 }
  0xcc   :  { %1292 = vmatpush3.bf16.msra.mxu0 %v1420_v38 }
  0xcd   :  { %1293 = vmatprep.subr.bf16.mxu0 %v1688_v0 }
  0xd0   :  { %1294 = vmatpush3.bf16.msra.mxu0 %v1421_v39 }
  0xd1   :  { %1323 = vmatprep.subr.bf16.mxu0 %v1688_v0 }
  0xd3   :  { %1296 = vmatmul.mubr.bf16.vlgmr.msra.gmra.mrb[4].mxu0 %v140_v19 }
  0xd4   :  { %1339 = vmatprep.mubr.msk.bf16.mxu0 %vm1689_vm0, %v1688_v0  ;;  %1324 = vmatpush3.bf16.msra.mxu0 %v1422_v7 }
  0xd5   :  { %1325 = vmatprep.subr.bf16.mxu0 %v1688_v0 }
  0xd8   :  { %1326 = vmatpush3.bf16.msra.mxu0 %v1423_v8 }
  0xd9   :  { %1327 = vmatprep.subr.bf16.mxu0 %v1688_v0 }
  0xdc   :  { %1328 = vmatpush3.bf16.msra.mxu0 %v1424_v9  ;;  %v1154_v9 = vld [vmem:[#allocation14 + $0x3] ss:$0 sm:$0xff] }
  0xdd   :  { %1329 = vmatprep.subr.bf16.mxu0 %v1688_v0 }
  0xe0   :  { %1330 = vmatpush3.bf16.msra.mxu0 %v1425_v10 }
  0xe1   :  { %1331 = vmatprep.subr.bf16.mxu0 %v1688_v0 }
  0xe4   :  { %1332 = vmatpush3.bf16.msra.mxu0 %v1426_v11 }
  0xe5   :  { %1333 = vmatprep.subr.bf16.mxu0 %v1688_v0 }
 0x185   :  { %v344_v20 = vpop.f32.mrb[0].mxu1  ;;  %v239_v24 = vpop.f32.mrb[0].mxu0 }
 0x186   :  { %v458_v21 = vpack.c.bf16 %v344_v20, %v344_v20  ;;  %v1277_v22 = vpop.f32.mrb[1].mxu1  ;;  %v1257_v26 = vpop.f32.mrb[1].mxu0  ;;  %v456_v29 = vpack.c.bf16 %v239_v24, %v239_v24  ;;  %v1429_v24 = vld [vmem:[#allocation10 + $0x38] sm:$0xff]  }
 0x187   :  { %v347_v23 = vpop.f32.mrb[2].mxu1  ;;  %v242_v27 = vpop.f32.mrb[2].mxu0  ;;  %v1427_v22 = vld [vmem:[#allocation10 + $0x28] sm:$0xff]  }
 0x188   :  { %v1278_v25 = vpop.f32.mrb[3].mxu1  ;;  %1300 = vmatpush3.bf16.xpose.msra.mxu1 %v458_v21  ;;  %v1258_v28 = vpop.f32.mrb[3].mxu0  ;;  %v459_v30 = vpack.c.bf16 %v347_v23, %v347_v23  ;;  %v457_v31 = vpack.c.bf16 %v242_v27, %v242_v27  ;;  %1334 = vmatpush3.bf16.msra.mxu0 %v1427_v22  ;;  %v1428_v23 = vld [vmem:[#allocation10 + $0x30] sm:$0xff]   ;;  %v1155_v22 = vld [vmem:[#allocation14] ss:$0 sm:$0xff] }
 0x189   :  { %1305 = vmatprep.subr.bf16.mxu1 %v1688_v0  ;;  %1335 = vmatprep.subr.bf16.mxu0 %v1688_v0 }
 0x18c   :  { %1336 = vmatpush3.bf16.msra.mxu0 %v1428_v23 }
 0x18d   :  { %1337 = vmatprep.subr.bf16.mxu0 %v1688_v0 }
 0x18f   :  { %1302 = vmatmul.mubr.bf16.vlgmr.msra.gmra.mrb[4].mxu1 %v456_v29 }
 0x190   :  { %1306 = vmatpush3.bf16.xpose.msra.mxu1 %v459_v30  ;;  %1307 = vmatprep.mubr.msk.bf16.mxu1 %vm1689_vm0, %v1688_v0 }
 0x191   :  { %1311 = vmatprep.subr.bf16.mxu1 %v1688_v0  ;;  %1338 = vmatpush3.bf16.msra.mxu0 %v1429_v24 }
 0x192   :  { %1363 = vmatprep.subr.bf16.mxu0 %v1688_v0 }
 0x197   :  { %1308 = vmatmul.mubr.bf16.vlgmr.msra.gmra.mrb[8].mxu1 %v457_v31 }
 0x198   :  { %1313 = vmatprep.mubr.msk.bf16.mxu1 %vm1689_vm0, %v1688_v0 }
 0x1a6   :  { %v449_v62 = vpop.f32.mrb[4].mxu0 }
 0x1a7   :  { %v1297_v63 = vpop.f32.mrb[5].mxu0  ;;  %v460_v2 = vpack.c.bf16 %v449_v62, %v449_v62 }
 0x1a8   :  { %v452_v1 = vpop.f32.mrb[6].mxu0 }
 0x1a9   :  { %v1298_v3 = vpop.f32.mrb[7].mxu0  ;;  %v461_v4 = vpack.c.bf16 %v452_v1, %v452_v1  ;;  %v574_v5 = vsel %vm572_vm2, %v460_v2, 0 }
 0x1aa   :  { %1312 = vmatpush3.bf16.msra.mxu1 %v574_v5  ;;  %v1153_v3 = vld [vmem:[#allocation14 + $0x2] ss:$0 sm:$0xff] }
 0x1ab   :  { %v620_v6 = vsel %vm572_vm2, %v461_v4, 0  ;;  %1317 = vmatprep.subr.bf16.mxu1 %v1688_v0 }
 0x262   :  { %v496_v40 = vpop.f32.mrb[4].mxu1 }
 0x263   :  { %v542_v41 = vmul.f32 0.17677669, %v496_v40  ;;  %v1303_v42 = vpop.f32.mrb[5].mxu1 }
 0x264   :  { %v499_v43 = vpop.f32.mrb[6].mxu1  ;;  %v1430_v42 = vld [vmem:[#allocation11] sm:$0xff]  }
 0x265   :  { %v1304_v44 = vpop.f32.mrb[7].mxu1  ;;  %v545_v45 = vsel %vm544_vm1, %v542_v41, -inf  ;;  %v1431_v43 = vld [vmem:[#allocation11 + $0x8] sm:$0xff]  }
 0x266   :  { %546 = vmax.xlane.f32.xlu0 %v545_v45  ;;  %v1434_v44 = vld [vmem:[#allocation11 + $0x20] sm:$0xff]   ;;  %v1435_v45 = vld [vmem:[#allocation11 + $0x28] sm:$0xff]  }
 0x26a   :  { %v536_v46 = vpop.f32.mrb[8].mxu1 }
 0x26b   :  { %v543_v47 = vmul.f32 0.17677669, %v536_v46  ;;  %v1309_v48 = vpop.f32.mrb[9].mxu1  ;;  %v1436_v46 = vld [vmem:[#allocation11 + $0x30] sm:$0xff]  }
 0x26c   :  { %v539_v49 = vpop.f32.mrb[10].mxu1  ;;  %v1438_v48 = vld [vmem:[#allocation13] sm:$0xff]  }
 0x26d   :  { %v1310_v50 = vpop.f32.mrb[11].mxu1  ;;  %v548_v51 = vsel %vm544_vm1, %v543_v47, -inf  ;;  %v1439_v49 = vld [vmem:[#allocation13 + $0x8] sm:$0xff]  }
 0x26e   :  { %549 = vmax.xlane.f32.xlu0 %v548_v51 }
 0x2f3   :  { %v547_v52 = vpop.xlane.xlu0 %546 }
 0x2f4   :  { %v551_v53 = vsub.f32 %v542_v41, %v547_v52 }
 0x2f6   :  { %v553_v54 = vmul.f32 1.442695, %v551_v53 }
 0x2f8   :  { %1446 = vpow2.f32 %v553_v54 }
 0x2fb   :  { %v550_v55 = vpop.xlane.xlu0 %549 }
 0x2fc   :  { %v552_v56 = vsub.f32 %v543_v47, %v550_v55  ;;  %v1437_v47 = vld [vmem:[#allocation11 + $0x38] sm:$0xff]  }
 0x2fe   :  { %v555_v57 = vmul.f32 1.442695, %v552_v56 }
 0x300   :  { %1448 = vpow2.f32 %v555_v57 }
 0x302   :  { %v1447_v58 = vpop.eup %1446 }
 0x303   :  { %v557_v59 = vsel %vm544_vm1, %v1447_v58, 0.0 }
 0x304   :  { %558 = vadd.xlane.f32.xlu1 %v557_v59 }
 0x30a   :  { %v1449_v60 = vpop.eup %1448 }
 0x30b   :  { %v560_v61 = vsel %vm544_vm1, %v1449_v60, 0.0 }
 0x30c   :  { %561 = vadd.xlane.f32.xlu1 %v560_v61 }
 0x391   :  { %v559_v12 = vpop.xlane.xlu1 %558 }
 0x392   :  { %1450 = vrcp.f32 %v559_v12 }
 0x399   :  { %v562_v13 = vpop.xlane.xlu1 %561 }
 0x39a   :  { %1452 = vrcp.f32 %v562_v13 }
 0x39c   :  { %v1451_v14 = vpop.eup %1450 }
 0x39d   :  { %v565_v15 = vmul.f32 %v1451_v14, %v1447_v58  ;;  %v1440_v14 = vld [vmem:[#allocation13 + $0x10] sm:$0xff]  }
 0x39f   :  { %v567_v18 = vpack.c.bf16 %v565_v15, %v565_v15  ;;  %v1441_v15 = vld [vmem:[#allocation13 + $0x18] sm:$0xff]  }
 0x3a1   :  { %1314 = vmatmul.mubr.msk.bf16.vlgmr.msra.gmra.mrb[12].mxu1 %vm544_vm1, %v567_v18  ;;  %v1442_v18 = vld [vmem:[#allocation13 + $0x20] sm:$0xff]  }
 0x3a2   :  { %1318 = vmatpush3.bf16.msra.mxu1 %v620_v6  ;;  %1319 = vmatprep.mubr.msk.bf16.mxu1 %vm1689_vm0, %v1688_v0 }
 0x3a3   :  { %1343 = vmatprep.subr.bf16.mxu1 %v1688_v0 }
 0x3a4   :  { %v1453_v19 = vpop.eup %1452 }
 0x3a5   :  { %v566_v20 = vmul.f32 %v1453_v19, %v1449_v60  ;;  %v1443_v19 = vld [vmem:[#allocation13 + $0x28] sm:$0xff]  }
 0x3a7   :  { %v568_v21 = vpack.c.bf16 %v566_v20, %v566_v20  ;;  %v1444_v20 = vld [vmem:[#allocation13 + $0x30] sm:$0xff]  }
 0x3a9   :  { %1320 = vmatmul.mubr.msk.bf16.vlgmr.msra.gmra.mrb[16].mxu1 %vm544_vm1, %v568_v21  ;;  %v1445_v21 = vld [vmem:[#allocation13 + $0x38] sm:$0xff]  }
 0x3aa   :  { %1359 = vmatprep.mubr.msk.bf16.mxu1 %vm1689_vm0, %v1688_v0  ;;  %1344 = vmatpush3.bf16.msra.mxu1 %v1430_v42 }
 0x3ab   :  { %1345 = vmatprep.subr.bf16.mxu1 %v1688_v0 }
 0x3ae   :  { %1346 = vmatpush3.bf16.msra.mxu1 %v1431_v43 }
 0x3af   :  { %1347 = vmatprep.subr.bf16.mxu1 %v1688_v0 }
 0x474   :  { %v610_v25 = vpop.f32.mrb[12].mxu1 }
 0x475   :  { %v1315_v26 = vpop.f32.mrb[13].mxu1 }
 0x476   :  { %v613_v27 = vpop.f32.mrb[14].mxu1 }
 0x477   :  { %v1316_v28 = vpop.f32.mrb[15].mxu1 }
 0x47c   :  { %v656_v29 = vpop.f32.mrb[16].mxu1 }
 0x47d   :  { %v662_v30 = vpack.c.bf16 %v656_v29, %v610_v25  ;;  %v1321_v31 = vpop.f32.mrb[17].mxu1 }
 0x47e   :  { %v659_v32 = vpop.f32.mrb[18].mxu1 }
 0x47f   :  { %v1322_v33 = vpop.f32.mrb[19].mxu1  ;;  %1340 = vmatmul.mubr.bf16.vlgmr.msra.gmra.mrb[8].mxu0 %v662_v30 }
 0x480   :  { %1379 = vmatprep.mubr.msk.bf16.mxu0 %vm1689_vm0, %v1688_v0  ;;  %1364 = vmatpush3.bf16.msra.mxu0 %v1438_v48 }
 0x481   :  { %1365 = vmatprep.subr.bf16.mxu0 %v1688_v0 }
 0x484   :  { %1366 = vmatpush3.bf16.msra.mxu0 %v1439_v49 }
 0x485   :  { %1367 = vmatprep.subr.bf16.mxu0 %v1688_v0 }
 0x488   :  { %1368 = vmatpush3.bf16.msra.mxu0 %v1440_v14 }
 0x489   :  { %1369 = vmatprep.subr.bf16.mxu0 %v1688_v0 }
 0x48c   :  { %1370 = vmatpush3.bf16.msra.mxu0 %v1441_v15 }
 0x48d   :  { %1371 = vmatprep.subr.bf16.mxu0 %v1688_v0 }
 0x490   :  { %1372 = vmatpush3.bf16.msra.mxu0 %v1442_v18 }
 0x491   :  { %1373 = vmatprep.subr.bf16.mxu0 %v1688_v0 }
 0x494   :  { %1374 = vmatpush3.bf16.msra.mxu0 %v1443_v19 }
 0x495   :  { %1375 = vmatprep.subr.bf16.mxu0 %v1688_v0 }
 0x498   :  { %1376 = vmatpush3.bf16.msra.mxu0 %v1444_v20 }
 0x499   :  { %1377 = vmatprep.subr.bf16.mxu0 %v1688_v0 }
 0x49c   :  { %1378 = vmatpush3.bf16.msra.mxu0 %v1445_v21 }
 0x552   :  { %v761_v34 = vpop.f32.mrb[8].mxu0 }
 0x553   :  { %v774_v35 = vadd.f32 %v761_v34, %v1877_v16  ;;  %v1341_v36 = vpop.f32.mrb[9].mxu0  ;;  %v1432_v16 = vld [vmem:[#allocation11 + $0x10] sm:$0xff]  }
 0x554   :  { %v764_v37 = vpop.f32.mrb[10].mxu0  ;;  %1348 = vmatpush3.bf16.msra.mxu1 %v1432_v16 }
 0x555   :  { %v775_v38 = vadd.f32 %v764_v37, %v1879_v17  ;;  %776 = vadd.xlane.f32.xlu0 %v774_v35  ;;  %v1342_v39 = vpop.f32.mrb[11].mxu0  ;;  %v782_v40 = vmul.f32 %v774_v35, %v774_v35  ;;  %1349 = vmatprep.subr.bf16.mxu1 %v1688_v0  ;;  %v1433_v17 = vld [vmem:[#allocation11 + $0x18] sm:$0xff]  }
 0x557   :  { %778 = vadd.xlane.f32.xlu1 %v775_v38  ;;  %v783_v41 = vmul.f32 %v775_v38, %v775_v38 }
 0x558   :  { %1350 = vmatpush3.bf16.msra.mxu1 %v1433_v17 }
 0x559   :  { %784 = vadd.xlane.f32.xlu0 %v782_v40  ;;  %1351 = vmatprep.subr.bf16.mxu1 %v1688_v0 }
 0x55b   :  { %786 = vadd.xlane.f32.xlu1 %v783_v41 }
 0x55c   :  { %1352 = vmatpush3.bf16.msra.mxu1 %v1434_v44 }
 0x55d   :  { %1353 = vmatprep.subr.bf16.mxu1 %v1688_v0 }
 0x560   :  { %1354 = vmatpush3.bf16.msra.mxu1 %v1435_v45  ;;  %v1166_v45 = vld [vmem:[#allocation14 + $0x1] ss:$0 sm:$0xff] }
 0x561   :  { %1355 = vmatprep.subr.bf16.mxu1 %v1688_v0 }
 0x564   :  { %1356 = vmatpush3.bf16.msra.mxu1 %v1436_v46 }
 0x565   :  { %1357 = vmatprep.subr.bf16.mxu1 %v1688_v0 }
 0x568   :  { %1358 = vmatpush3.bf16.msra.mxu1 %v1437_v47 }
 0x5e2   :  { %v777_v50 = vpop.xlane.xlu0 %776 }
 0x5e3   :  { %v780_v51 = vmul.f32 0.03125, %v777_v50 }
 0x5e4   :  { %v779_v52 = vpop.xlane.xlu1 %778 }
 0x5e5   :  { %v781_v53 = vmul.f32 0.03125, %v779_v52  ;;  %v790_v55 = vmul.f32 %v780_v51, %v780_v51  ;;  %v794_v1 = vsub.f32 %v774_v35, %v780_v51 }
 0x5e6   :  { %v785_v54 = vpop.xlane.xlu0 %784 }
 0x5e7   :  { %v788_v56 = vmul.f32 0.03125, %v785_v54  ;;  %v791_v58 = vmul.f32 %v781_v53, %v781_v53  ;;  %v795_v4 = vsub.f32 %v775_v38, %v781_v53 }
 0x5e8   :  { %v787_v57 = vpop.xlane.xlu1 %786 }
 0x5e9   :  { %v792_v59 = vsub.f32 %v788_v56, %v790_v55  ;;  %v789_v60 = vmul.f32 0.03125, %v787_v57 }
 0x5eb   :  { %v796_v61 = vadd.f32 1e-05, %v792_v59  ;;  %v793_v62 = vsub.f32 %v789_v60, %v791_v58 }
 0x5ed   :  { %1454 = vrsqrt.f32 %v796_v61  ;;  %v797_v63 = vadd.f32 1e-05, %v793_v62 }
 0x5ef   :  { %1456 = vrsqrt.f32 %v797_v63 }
 0x5f7   :  { %v1455_v2 = vpop.eup %1454 }
 0x5f8   :  { %v800_v5 = vmul.f32 %v1455_v2, %v794_v1 }
 0x5f9   :  { %v1457_v6 = vpop.eup %1456 }
 0x5fa   :  { %v801_v7 = vmul.f32 %v1457_v6, %v795_v4  ;;  %v806_v8 = vmul.f32 %v1153_v3, %v800_v5 }
 0x5fc   :  { %v807_v10 = vmul.f32 %v1153_v3, %v801_v7  ;;  %v812_v11 = vadd.f32 %v1154_v9, %v806_v8 }
 0x5fe   :  { %v813_v12 = vadd.f32 %v1154_v9, %v807_v10  ;;  %v1175_v9 = vld [vmem:[#allocation14 + $0x4] ss:$0 sm:$0xff] }
 0x600   :  { %v814_v13 = vpack.c.bf16 %v813_v12, %v812_v11 }
 0x602   :  { %1360 = vmatmul.mubr.bf16.vlgmr.msra.gmra.mrb[20].mxu1 %v814_v13  ;;  %v1176_v13 = vld [vmem:[#allocation14 + $0x5] ss:$0 sm:$0xff] }
 0x6d5   :  { %v917_v23 = vpop.f32.mrb[20].mxu1 }
 0x6d6   :  { %v918_v24 = vadd.f32 %v1155_v22, %v917_v23  ;;  %v1361_v25 = vpop.f32.mrb[21].mxu1 }
 0x6d7   :  { %v920_v26 = vpop.f32.mrb[22].mxu1 }
 0x6d8   :  { %v924_v27 = vmin.f32 %v918_v24, 0.0  ;;  %v921_v28 = vadd.f32 %v1155_v22, %v920_v26  ;;  %v1362_v29 = vpop.f32.mrb[23].mxu1  ;;  %vm942_vm5 = vcmp.gt.f32.partialorder %v918_v24, 0.0 }
 0x6da   :  { %v934_v30 = vmul.f32 1.442695, %v924_v27  ;;  %v925_v31 = vmin.f32 %v921_v28, 0.0  ;;  %v928_v33 = vmul.f32 0.5, %v924_v27  ;;  %vm926_vm3 = vcmp.gt.f32.partialorder %v924_v27, -0.001 }
 0x6db   :  { %vm943_vm6 = vcmp.gt.f32.partialorder %v921_v28, 0.0 }
 0x6dc   :  { %1458 = vpow2.f32 %v934_v30  ;;  %v936_v32 = vmul.f32 1.442695, %v925_v31  ;;  %v929_v34 = vmul.f32 0.5, %v925_v31  ;;  %v930_v35 = vmul.f32 %v928_v33, %v924_v27 }
 0x6dd   :  { %vm927_vm4 = vcmp.gt.f32.partialorder %v925_v31, -0.001 }
 0x6de   :  { %1460 = vpow2.f32 %v936_v32  ;;  %v931_v0 = vmul.f32 %v929_v34, %v925_v31  ;;  %v932_v38 = vadd.f32 %v930_v35, %v924_v27 }
 0x6e0   :  { %v933_v41 = vadd.f32 %v931_v0, %v925_v31 }
 0x6e6   :  { %v1459_v36 = vpop.eup %1458 }
 0x6e7   :  { %v1164_v37 = vadd.f32 -1.0, %v1459_v36 }
 0x6e8   :  { %v1461_v39 = vpop.eup %1460 }
 0x6e9   :  { %v940_v40 = vsel %vm926_vm3, %v932_v38, %v1164_v37  ;;  %v1165_v42 = vadd.f32 -1.0, %v1461_v39 }
 0x6ea   :  { %v944_v16 = vsel %vm942_vm5, %v918_v24, %v940_v40 }
 0x6eb   :  { %v941_v43 = vsel %vm927_vm4, %v933_v41, %v1165_v42 }
 0x6ec   :  { %v945_v17 = vsel %vm943_vm6, %v921_v28, %v941_v43 }
 0x6ed   :  { %v946_v44 = vpack.c.bf16 %v945_v17, %v944_v16 }
 0x6ef   :  { %1380 = vmatmul.mubr.bf16.vlgmr.msra.gmra.mrb[12].mxu0 %v946_v44 }
 0x7c2   :  { %v1049_v46 = vpop.f32.mrb[12].mxu0 }
 0x7c3   :  { %v1050_v47 = vadd.f32 %v1166_v45, %v1049_v46  ;;  %v1381_v48 = vpop.f32.mrb[13].mxu0 }
 0x7c4   :  { %v1052_v49 = vpop.f32.mrb[14].mxu0 }
 0x7c5   :  { %v1056_v50 = vadd.f32 %v1050_v47, %v812_v11  ;;  %v1053_v51 = vadd.f32 %v1166_v45, %v1052_v49  ;;  %v1382_v52 = vpop.f32.mrb[15].mxu0 }
 0x7c7   :  { %v1057_v53 = vadd.f32 %v1053_v51, %v813_v12  ;;  %1058 = vadd.xlane.f32.xlu0 %v1056_v50  ;;  %v1064_v54 = vmul.f32 %v1056_v50, %v1056_v50 }
 0x7c9   :  { %1060 = vadd.xlane.f32.xlu1 %v1057_v53  ;;  %v1065_v55 = vmul.f32 %v1057_v53, %v1057_v53 }
 0x7cb   :  { %1066 = vadd.xlane.f32.xlu0 %v1064_v54 }
 0x7cd   :  { %1068 = vadd.xlane.f32.xlu1 %v1065_v55 }
 0x854   :  { %v1059_v56 = vpop.xlane.xlu0 %1058 }
 0x855   :  { %v1062_v57 = vmul.f32 0.03125, %v1059_v56 }
 0x856   :  { %v1061_v58 = vpop.xlane.xlu1 %1060 }
 0x857   :  { %v1063_v59 = vmul.f32 0.03125, %v1061_v58  ;;  %v1072_v61 = vmul.f32 %v1062_v57, %v1062_v57  ;;  %v1076_v7 = vsub.f32 %v1056_v50, %v1062_v57 }
 0x858   :  { %v1067_v60 = vpop.xlane.xlu0 %1066 }
 0x859   :  { %v1070_v62 = vmul.f32 0.03125, %v1067_v60  ;;  %v1073_v1 = vmul.f32 %v1063_v59, %v1063_v59  ;;  %v1077_v10 = vsub.f32 %v1057_v53, %v1063_v59 }
 0x85a   :  { %v1069_v63 = vpop.xlane.xlu1 %1068 }
 0x85b   :  { %v1074_v2 = vsub.f32 %v1070_v62, %v1072_v61  ;;  %v1071_v3 = vmul.f32 0.03125, %v1069_v63 }
 0x85d   :  { %v1078_v4 = vadd.f32 1e-05, %v1074_v2  ;;  %v1075_v5 = vsub.f32 %v1071_v3, %v1073_v1 }
 0x85f   :  { %1462 = vrsqrt.f32 %v1078_v4  ;;  %v1079_v6 = vadd.f32 1e-05, %v1075_v5 }
 0x861   :  { %1464 = vrsqrt.f32 %v1079_v6 }
 0x869   :  { %v1463_v8 = vpop.eup %1462 }
 0x86a   :  { %v1082_v11 = vmul.f32 %v1463_v8, %v1076_v7 }
 0x86b   :  { %v1465_v12 = vpop.eup %1464 }
 0x86c   :  { %v1083_v14 = vmul.f32 %v1465_v12, %v1077_v10  ;;  %v1088_v15 = vmul.f32 %v1175_v9, %v1082_v11 }
 0x86e   :  { %v1089_v18 = vmul.f32 %v1175_v9, %v1083_v14  ;;  %v1094_v19 = vadd.f32 %v1176_v13, %v1088_v15 }
 0x870   :  { %v1095_v20 = vadd.f32 %v1176_v13, %v1089_v18  ;;  %1096 = vst [vmem:[#allocation16] sm:$0xff] %v1094_v19 }
 0x872   :  { %1097 = vst [vmem:[#allocation16 + $0x8] sm:$0xff] %v1095_v20 }
 0x873   :  { %1653 = shalt.err (!%p1650_p12)
}
 0x874   :  { %s1654_s13 = scalar_lea.hbm %s1969_s8, 256 }
 0x875   :  { %p1655_p13 = scmp.ne.s32.totalorder %s1969_s8, %s1654_s13  ;;  %p1658_p0 = scmp.lt.u32.totalorder %s1654_s13, %s1969_s8 }
 0x877   :  { %p1660_p1 = pnand %p1658_p0, %p1655_p13 }
 0x879   :  { %1663 = shalt.err (!%p1660_p1)
}
 0x87a   :  { %1109 = dma.vmem_to_hbm [thread:$0]  %s1104_s16, 256, %s1969_s8, [#allocation4], %s1682_s5, %s1682_s5, %s1683_s22  }
 0x87b   :  { %1674 = dma.done.wait [#allocation4], 256  }
 0x87c   :  { %1675 = vsyncadd [#allocation4], 4294967040 }
 0x87d   :  { %1113 = vsyncpa [#allocation3], 1 }
 0x87e   :  { %1114 = vsyncpa [#allocation6], 1 }
 0x87f   :  { %1115 = vsyncpa [#allocation9], 1 }
 0x880   :  { %1116 = vsyncpa [#allocation12], 1 }
 0x881   :  { %1117 = vsyncpa [#allocation15], 1 }
 0x882   :  { %1118 = vsyncpa [#allocation4], 1 }

</bundles_post_ra>
